<compile_context>
chip_gen: v6e
topology: v6e:2x2x1
jax: 0.10.0
libtpu: 0.0.40
codegen_flags: <defaults>
</compile_context>

<pallas_src>
import functools

import jax
import jax.numpy as jnp
from jax.experimental import pallas as pl
from jax.experimental.pallas import tpu as pltpu


_LANE = 128
_SLACK_BYTES = 1 << 20  # headroom for semaphores / compiler-internal scratch


def _round_up(x, m):
    return ((x + m - 1) // m) * m


def _sublane_granule(dtype) -> int:
    # f32 -> 8 rows per sublane tile, bf16 -> 16, int8/fp8 -> 32 (sublane packing).
    return {4: 8, 2: 16, 1: 32}.get(jnp.dtype(dtype).itemsize, 8)


def _vmem_budget_bytes() -> int:
    # ~75% of physical VMEM: ~96 MiB on v5e/v6e (128 MiB), ~48 MiB on v7x (64 MiB).
    try:
        cap = getattr(pltpu.get_tpu_info(), "vmem_capacity_bytes", None)
    except Exception:
        cap = None
    if not cap:
        cap = 64 << 20  # conservative (v7x-sized) fallback
    return int(cap) * 3 // 4


def _maybe_single_buffered(block_shape, index_map):
    """BlockSpec for a constant-index block: request single buffering if supported."""
    if hasattr(pl, "Buffered"):
        try:
            return pl.BlockSpec(block_shape, index_map, pipeline_mode=pl.Buffered(1))
        except TypeError:
            pass  # older API without pipeline_mode -> default (double) buffering
    return pl.BlockSpec(block_shape, index_map)


def _choose_k_tile(d, c_pad, w_itemsize, budget):
    """Split the hidden dim only when the resident fused weight would blow VMEM."""
    if d * c_pad * w_itemsize <= budget // 3:
        return d  # whole weight stays VMEM-resident (single-buffered)
    for cand in range((d // _LANE) * _LANE, 0, -_LANE):
        if d % cand == 0 and 2 * cand * c_pad * w_itemsize <= budget // 3:
            return cand
    # TODO(synk): pad D in the wrapper when it has no 128-multiple divisor that fits.
    return d


def fold_ensemble_weights(w1, b1, w2, b2, w3, b3, *, dtype):
    """One-time fold of the three linear heads (and the /3) into one padded head.

    Exact algebra: (xW1+b1 + xW2+b2 + xW3+b3)/3 == x @ W_avg + b_avg. Valid ONLY
    because the sub-models are purely linear in the shared input x.
    Returns (w_pad, b_pad, num_classes); class dim zero-padded to 128 lanes.
    """
    f32 = jnp.float32
    w_avg = (w1.astype(f32) + w2.astype(f32) + w3.astype(f32)) * f32(1.0 / 3.0)
    b_avg = (b1.astype(f32) + b2.astype(f32) + b3.astype(f32)) * f32(1.0 / 3.0)
    b_avg = b_avg.reshape(1, -1)
    _, c = w_avg.shape
    c_pad = _round_up(c, _LANE)
    if c_pad != c:
        w_avg = jnp.pad(w_avg, ((0, 0), (0, c_pad - c)))
        b_avg = jnp.pad(b_avg, ((0, 0), (0, c_pad - c)))
    return w_avg.astype(dtype), b_avg.astype(dtype), c


def _ensemble_kernel(x_ref, w_ref, b_ref, o_ref, acc_ref):
    k = pl.program_id(1)

    @pl.when(k == 0)
    def _init():
        acc_ref[...] = jnp.zeros_like(acc_ref)

    # One MXU matmul per (batch-tile, k-tile); accumulate in f32.
    acc_ref[...] += jnp.dot(x_ref[...], w_ref[...],
                            preferred_element_type=jnp.float32)

    @pl.when(k == pl.num_programs(1) - 1)
    def _finalize():
        o_ref[...] = (acc_ref[...] + b_ref[...].astype(jnp.float32)
                      ).astype(o_ref.dtype)


@functools.partial(jax.jit, static_argnames=("num_classes", "max_block_b"))
def ensemble_forward(x, w_pad, b_pad, *, num_classes, max_block_b=1024):
    """Hot path: one streamed matmul + bias against the pre-folded head."""
    B, D = x.shape
    Dw, Cp = w_pad.shape
    assert Dw == D and Cp % _LANE == 0 and b_pad.shape == (1, Cp)

    bx = jnp.dtype(x.dtype).itemsize
    bw = jnp.dtype(w_pad.dtype).itemsize
    bo = bx  # output emitted in x.dtype

    budget = _vmem_budget_bytes()
    tk = _choose_k_tile(D, Cp, bw, budget)
    nk = D // tk
    single_buffer_w = nk == 1
    n_w_bufs = 1 if single_buffer_w else 2

    granule = _sublane_granule(x.dtype)

    # Resident bytes: weight buffers + bias + slack are fixed; per batch-row we
    # pay double-buffered x + double-buffered out + the f32 accumulator.
    fixed = n_w_bufs * tk * Cp * bw + Cp * bw + _SLACK_BYTES
    per_row = 2 * tk * bx + 2 * Cp * bo + Cp * 4
    tb = max(granule, (budget - fixed) // per_row)
    tb = min(tb, max_block_b, _round_up(B, granule))
    # >= 2 grid steps so v7x's two TensorCores both run and DMA overlaps compute.
    half = (pl.cdiv(B, 2) // granule) * granule
    if half >= granule:
        tb = min(tb, half)
    tb = max(granule, (tb // granule) * granule)

    grid = (pl.cdiv(B, tb), nk)

    vmem_limit = min(128 << 20, max(32 << 20, fixed + per_row * tb + _SLACK_BYTES))

    cost = pl.CostEstimate(
        flops=2 * B * D * Cp,
        transcendentals=0,
        bytes_accessed=B * D * bx + D * Cp * bw + Cp * bw + B * Cp * bo,
    )

    w_spec = (_maybe_single_buffered((tk, Cp), lambda i, k: (k, 0))
              if single_buffer_w
              else pl.BlockSpec((tk, Cp), lambda i, k: (k, 0)))

    out_pad = pl.pallas_call(
        _ensemble_kernel,
        out_shape=jax.ShapeDtypeStruct((B, Cp), x.dtype),
        grid=grid,
        in_specs=[
            pl.BlockSpec((tb, tk), lambda i, k: (i, k)),            # x streams
            w_spec,                                                 # fused weight
            _maybe_single_buffered((1, Cp), lambda i, k: (0, 0)),   # fused bias
        ],
        out_specs=pl.BlockSpec((tb, Cp), lambda i, k: (i, 0)),
        scratch_shapes=[pltpu.VMEM((tb, Cp), jnp.float32)],
        compiler_params=pltpu.CompilerParams(
            dimension_semantics=("parallel", "arbitrary"),
            vmem_limit_bytes=int(vmem_limit),
        ),
        cost_estimate=cost,
    )(x, w_pad, b_pad)

    return out_pad if num_classes == Cp else out_pad[:, :num_classes]


if __name__ == "__main__":
    key = jax.random.PRNGKey(0)
    B, D, C = 64, 32, 10  # batch, hidden, num_classes (C < 128 exercises lane padding)

    ks = jax.random.split(key, 7)
    x = jax.random.normal(ks[0], (B, D), dtype=jnp.float32)
    w1 = jax.random.normal(ks[1], (D, C), dtype=jnp.float32) * 0.1
    b1 = jax.random.normal(ks[2], (1, C), dtype=jnp.float32) * 0.1
    w2 = jax.random.normal(ks[3], (D, C), dtype=jnp.float32) * 0.1
    b2 = jax.random.normal(ks[4], (1, C), dtype=jnp.float32) * 0.1
    w3 = jax.random.normal(ks[5], (D, C), dtype=jnp.float32) * 0.1
    b3 = jax.random.normal(ks[6], (1, C), dtype=jnp.float32) * 0.1

    # One-time fold, hoisted out of the per-call hot path (perf review).
    w_pad, b_pad, nc = fold_ensemble_weights(w1, b1, w2, b2, w3, b3, dtype=x.dtype)

    out = ensemble_forward(x, w_pad, b_pad, num_classes=nc)
    out = jax.block_until_ready(out)

    # Pure-JAX reference of the original ensemble semantics.
    ref = ((x @ w1 + b1) + (x @ w2 + b2) + (x @ w3 + b3)) / 3.0
    assert out.shape == ref.shape and out.dtype == ref.dtype
    assert jnp.allclose(out, ref, atol=1e-5, rtol=1e-5), "mismatch vs reference"

    print("KERNEL_OK")
</pallas_src>

<mosaic_0001>
module attributes {stable_mosaic.version = 11 : i64} {
  func.func @_ensemble_kernel(%arg0: i32, %arg1: i32, %arg2: memref<32x32xf32, #tpu.memory_space<vmem>>, %arg3: memref<32x128xf32, #tpu.memory_space<vmem>>, %arg4: memref<1x128xf32, #tpu.memory_space<vmem>>, %arg5: memref<32x128xf32, #tpu.memory_space<vmem>>, %arg6: memref<32x128xf32, #tpu.memory_space<vmem>>) attributes {dimension_semantics = [#tpu.dimension_semantics<parallel>, #tpu.dimension_semantics<arbitrary>], iteration_bounds = array<i64: 2, 1>, scalar_prefetch = 0 : i64, scratch_operands = 1 : i64, tpu.core_type = #tpu.core_type<tc>, window_params = [{transform_indices = @transform_0, window_bounds = array<i64: 32, 32>}, {pipeline_mode = #tpu.pipeline_mode<synchronous>, transform_indices = @transform_1, window_bounds = array<i64: 32, 128>}, {pipeline_mode = #tpu.pipeline_mode<synchronous>, transform_indices = @transform_2, window_bounds = array<i64: 1, 128>}, {transform_indices = @transform_3, window_bounds = array<i64: 32, 128>}]} {
    %c0_i32 = arith.constant 0 : i32
    %0 = arith.cmpi eq, %arg1, %c0_i32 : i32
    %1 = arith.extui %0 : i1 to i32
    %c0_i32_0 = arith.constant 0 : i32
    %2 = arith.cmpi ne, %1, %c0_i32_0 : i32
    scf.if %2 {
      %cst_10 = arith.constant 0.000000e+00 : f32
      %12 = vector.broadcast %cst_10 : f32 to vector<32x128xf32>
      %c0_11 = arith.constant 0 : index
      %c0_12 = arith.constant 0 : index
      %13 = vector.load %arg6[%c0_11, %c0_12] : memref<32x128xf32, #tpu.memory_space<vmem>>, vector<32x128xf32>
      tpu.vector_store %arg6[%c0_11, %c0_12], %12 {strides = array<i32>} : memref<32x128xf32, #tpu.memory_space<vmem>>, vector<32x128xf32>,
    } else {
    }
    %c0 = arith.constant 0 : index
    %c0_1 = arith.constant 0 : index
    %3 = vector.load %arg6[%c0, %c0_1] : memref<32x128xf32, #tpu.memory_space<vmem>>, vector<32x128xf32>
    %c0_2 = arith.constant 0 : index
    %c0_3 = arith.constant 0 : index
    %4 = vector.load %arg2[%c0_2, %c0_3] : memref<32x32xf32, #tpu.memory_space<vmem>>, vector<32x32xf32>
    %c0_4 = arith.constant 0 : index
    %c0_5 = arith.constant 0 : index
    %5 = vector.load %arg3[%c0_4, %c0_5] : memref<32x128xf32, #tpu.memory_space<vmem>>, vector<32x128xf32>
    %cst = arith.constant dense<0.000000e+00> : vector<32x128xf32>
    %6 = tpu.matmul %4, %5, %cst {dimension_numbers = #tpu.dot_dimension_numbers<[1], [0], [0], [1], [0, 0, 1, 1], [], []>} : vector<32x32xf32>, vector<32x128xf32>, vector<32x128xf32> -> vector<32x128xf32>
    %7 = arith.addf %3, %6 : vector<32x128xf32>
    %c0_6 = arith.constant 0 : index
    %c0_7 = arith.constant 0 : index
    %8 = vector.load %arg6[%c0_6, %c0_7] : memref<32x128xf32, #tpu.memory_space<vmem>>, vector<32x128xf32>
    tpu.vector_store %arg6[%c0_6, %c0_7], %7 {strides = array<i32>} : memref<32x128xf32, #tpu.memory_space<vmem>>, vector<32x128xf32>,
    %c0_i32_8 = arith.constant 0 : i32
    %9 = arith.cmpi eq, %arg1, %c0_i32_8 : i32
    %10 = arith.extui %9 : i1 to i32
    %c0_i32_9 = arith.constant 0 : i32
    %11 = arith.cmpi ne, %10, %c0_i32_9 : i32
    scf.if %11 {
      %c0_10 = arith.constant 0 : index
      %c0_11 = arith.constant 0 : index
      %12 = vector.load %arg6[%c0_10, %c0_11] : memref<32x128xf32, #tpu.memory_space<vmem>>, vector<32x128xf32>
      %c0_12 = arith.constant 0 : index
      %c0_13 = arith.constant 0 : index
      %13 = vector.load %arg4[%c0_12, %c0_13] : memref<1x128xf32, #tpu.memory_space<vmem>>, vector<1x128xf32>
      %14 = vector.broadcast %13 : vector<1x128xf32> to vector<32x128xf32>
      %15 = arith.addf %12, %14 : vector<32x128xf32>
      %c0_14 = arith.constant 0 : index
      %c0_15 = arith.constant 0 : index
      %16 = vector.load %arg5[%c0_14, %c0_15] : memref<32x128xf32, #tpu.memory_space<vmem>>, vector<32x128xf32>
      tpu.vector_store %arg5[%c0_14, %c0_15], %15 {strides = array<i32>} : memref<32x128xf32, #tpu.memory_space<vmem>>, vector<32x128xf32>,
    } else {
    }
    return
  }
  func.func @transform_0(%arg0: i32, %arg1: i32) -> (i32, i32) {
    %c0_i32 = arith.constant 0 : i32
    return %arg0, %arg1 : i32, i32
  }
  func.func @transform_1(%arg0: i32, %arg1: i32) -> (i32, i32) {
    %c0_i32 = arith.constant 0 : i32
    %c0_i32_0 = arith.constant 0 : i32
    return %arg1, %c0_i32 : i32, i32
  }
  func.func @transform_2(%arg0: i32, %arg1: i32) -> (i32, i32) {
    %c0_i32 = arith.constant 0 : i32
    %c0_i32_0 = arith.constant 0 : i32
    %c0_i32_1 = arith.constant 0 : i32
    return %c0_i32, %c0_i32_0 : i32, i32
  }
  func.func @transform_3(%arg0: i32, %arg1: i32) -> (i32, i32) {
    %c0_i32 = arith.constant 0 : i32
    %c0_i32_0 = arith.constant 0 : i32
    return %arg0, %c0_i32 : i32, i32
  }
}

</mosaic_0001>

<bundles_post_ra>
// kernel: ensemble_forward.1
= control target key start
LH: loop header
LB: loop body
LE: loop exit
PB: predicated region body
PF: predicated region fallthrough
CT: control target
= control target key end

     0   :  { %s565_s12 = smov 0   ;;  %s567_s13 = smov 0   ;;  %s613_s0 = inlined_call_operand.vmem [shape: f32[64,32], index: 0, kind: input, shape index: {}]   ;;  %s614_s1 = inlined_call_operand.vmem [shape: f32[32,128], index: 1, kind: input, shape index: {}]   ;;  %s615_s2 = inlined_call_operand.vmem [shape: f32[1,128], index: 2, kind: input, shape index: {}]   ;;  %s616_s3 = inlined_call_operand.vmem [shape: f32[64,128], index: 3, kind: output, shape index: {}]  }
   0x1   :  { %s569_s14 = smov 0  }
   0x2 LB: > { %s25_s15 = sadd.s32 1, %s539_s13  ;;  %p455_p0 = scmp.ge.s32.totalorder %s543_s14, 1  ;;  %s543_s14 = sphi %s569_s14, %s13_s14   ;;  %s539_s13 = sphi %s567_s13, %s618_s13   ;;  %s535_s12 = sphi %s565_s12, %s617_s12  }
   0x3   : > { %p27_p1 = scmp.ge.s32.totalorder %s25_s15, 2  ;;  %p166_p2 = scmp.lt.s32.totalorder %s543_s14, 3 }
   0x5   : > { %s620_s15 = smov (%p27_p1, %s25_s15), 0  ;;  %p167_p3 = pnand %p455_p0, %p166_p2 }
   0x6   : > { %s456_s20 = sshll.u32 (!%p167_p3), %s535_s12, 2 }
   0x7   : > { %170 = sbr.rel (%p167_p3) target bundleno = 220 (0xdc), region = 32  ;;  %p199_p4 = scmp.lt.s32.totalorder (!%p167_p3), %s456_s20, 7 }
   0xc   : > { %v238_v0 = vld [vmem:[%s614_s1 + $0x18] sm:$0xff]  ;;  %v237_v1 = vld [vmem:[%s614_s1 + $0x10] sm:$0xff]  ;;  %v236_v2 = vld [vmem:[%s614_s1 + $0x8] sm:$0xff]  ;;  %s622_s20 = smov (!%p199_p4, %s456_s20), 7  ;;  %vm239_vm0 = vcmask 261120  }
   0xd   : > { %475 = vmatprep.subr.mxu0 %v238_v0  ;;  %489 = vmatprep.subr.mxu1 %v238_v0  ;;  %v235_v3 = vld [vmem:[%s614_s1] sm:$0xff]  ;;  %s457_s25 = sshll.u32 %s622_s20, 3 }
   0xe   : > { %476 = vmatpush3.msra.mxu0 %v238_v0  ;;  %493 = vmatpush3.msra.mxu1 %v238_v0  ;;  %s205_s28 = scalar_lea.vmem %s613_s0, %s457_s25  ;;  %v464_v10 = vld [vmem:[%s615_s2] ss:$0 sm:$0xff]  ;;  %s217_s6 = scalar_lea.vmem %s616_s3, %s457_s25 }
   0xf   : > { %477 = vmatprep.subr.mxu0 %v237_v1  ;;  %490 = vmatprep.subr.mxu1 %v237_v1  ;;  %v231_v4 = vld [vmem:[%s205_s28] sm:$0xff]  ;;  %v233_v5 = vld [vmem:[%s205_s28 + $0x10] sm:$0xff]  ;;  %v232_v6 = vld [vmem:[%s205_s28 + $0x8] sm:$0xff] }
  0x10   : > { %478 = vmatpush3.msra.mxu0 %v237_v1  ;;  %494 = vmatpush3.msra.mxu1 %v237_v1  ;;  %v234_v7 = vld [vmem:[%s205_s28 + $0x18] sm:$0xff] }
  0x11   : > { %479 = vmatprep.subr.mxu0 %v236_v2  ;;  %491 = vmatprep.subr.mxu1 %v236_v2 }
  0x12   : > { %480 = vmatpush3.msra.mxu0 %v236_v2  ;;  %495 = vmatpush3.msra.mxu1 %v236_v2 }
  0x13   : > { %481 = vmatprep.subr.mxu0 %v235_v3  ;;  %492 = vmatprep.subr.mxu1 %v235_v3 }
  0x14   : > { %482 = vmatpush3.msra.mxu0 %v235_v3  ;;  %496 = vmatpush3.msra.mxu1 %v235_v3 }
  0x15   : > { %483 = vmatprep.mubr.msk.f32.mxu0 %vm239_vm0, %v231_v4  ;;  %486 = vmatprep.mubr.msk.f32.mxu1 %vm239_vm0, %v233_v5 }
  0x16   : > { %484 = vmatmul.mubr.msk.f32.vlgmr.msra.gmra.mxu0 %vm239_vm0, %v232_v6  ;;  %487 = vmatmul.mubr.msk.f32.vlgmr.msra.gmra.mxu1 %vm239_vm0, %v234_v7 }
  0xd6   : > { %v485_v8 = vpop.f32.mrf.mxu0  ;;  %v488_v9 = vpop.f32.mrf.mxu1 }
  0xd7   : > { %v360_v14 = vadd.f32 %v485_v8, %v464_v10  ;;  %v362_v16 = vadd.f32 %v488_v9, %v464_v10 }
  0xd8   : > { %v318_v11 = vpop.f32.mrf.mxu0  ;;  %v328_v12 = vpop.f32.mrf.mxu1 }
  0xd9   : > { %v359_v13 = vadd.f32 %v464_v10, %v318_v11  ;;  %v361_v15 = vadd.f32 %v464_v10, %v328_v12  ;;  %364 = vst [vmem:[%s217_s6 + $0x8] sm:$0xff] %v360_v14  ;;  %366 = vst [vmem:[%s217_s6 + $0x18] sm:$0xff] %v362_v16 }
  0xdb   : > { %363 = vst [vmem:[%s217_s6] sm:$0xff] %v359_v13  ;;  %365 = vst [vmem:[%s217_s6 + $0x10] sm:$0xff] %v361_v15 }
  0xdc PF: > { %s13_s14 = sadd.s32 1, %s543_s14   ;;  %s617_s12 = smov %s539_s13 }
  0xdd   : > { %p10_p5 = scmp.ge.s32.totalorder %s13_s14, 4   ;;  %s618_s13 = smov %s620_s15 }
  0xdf   :  { %12 = sbr.rel (!%p10_p5) target bundleno = 2 (0x2), region = 73 }

</bundles_post_ra>
